<compile_context>
chip_gen: v7x
topology: tpu7x:2x2x1
jax: 0.10.0
libtpu: 0.0.40
codegen_flags: <defaults>
</compile_context>

<pallas_src>
import functools

import jax
import jax.numpy as jnp
from jax import lax
from jax.experimental import pallas as pl
from jax.experimental.pallas import tpu as pltpu


def _lstm_net_kernel(x_ref, w_ih_t_ref, w_hh_t_ref, b_ref, w_out_t_ref,
                     b_out_ref, out_ref, *, seq_len, batch):
    """x_ref: (T*B, E); weights pre-transposed; out_ref: (B, C)."""
    H = w_hh_t_ref.shape[0]
    B = batch

    # Loop-invariant operand: load once, reuse across all timesteps.
    w_hh_t = w_hh_t_ref[...]                              # (H, 4H)

    # Hoisted input projection + fused (b_ih + b_hh) bias: ONE MXU matmul over all
    # timesteps, off the serial h->h dependency chain.
    xproj = (jnp.dot(x_ref[...], w_ih_t_ref[...],
                     preferred_element_type=jnp.float32)
             + b_ref[...])                                # (T*B, 4H)

    h = jnp.zeros((B, H), jnp.float32)
    c = jnp.zeros((B, H), jnp.float32)

    # Static Python loop == fully unrolled (T is tiny and static). Per-step critical
    # path: one (B,H)x(H,4H) MXU matmul + 2 full-width EUP pushes + VALU combine.
    for t in range(seq_len):
        gates = (xproj[t * B:(t + 1) * B, :]
                 + jnp.dot(h, w_hh_t, preferred_element_type=jnp.float32))  # (B, 4H)
        # Full-width activations over the single 4H=128 lane tile; PyTorch gate
        # order along 4H is [i, f, g, o].
        sig = jax.nn.sigmoid(gates)
        th = jnp.tanh(gates)
        i_g = sig[:, 0 * H:1 * H]
        f_g = sig[:, 1 * H:2 * H]
        g_g = th[:, 2 * H:3 * H]
        o_g = sig[:, 3 * H:4 * H]
        c = f_g * c + i_g * g_g
        h = o_g * jnp.tanh(c)
    # TODO(synk): if bundle dumps show dependent XLU lane-rotates from the H=32
    # lane-offset gate slices, switch the h/c carry to a feature-major layout.

    # Classifier head + numerically stable log_softmax, once, after the loop.
    logits = (jnp.dot(h, w_out_t_ref[...], preferred_element_type=jnp.float32)
              + b_out_ref[...])                           # (B, C)
    m = jnp.max(logits, axis=-1, keepdims=True)
    s = logits - m
    out_ref[...] = s - jnp.log(jnp.sum(jnp.exp(s), axis=-1, keepdims=True))


def prepare_params(params):
    """One-time layout prep (do NOT run per inference call): pre-transpose weights
    so the in-kernel matmuls need no .T, and fuse the two LSTM biases."""
    w_ih, w_hh, b_ih, b_hh, w_out, b_out = params
    H = w_hh.shape[1]
    return (jnp.asarray(w_ih.T),                      # (E, 4H)
            jnp.asarray(w_hh.T),                      # (H, 4H)
            (b_ih + b_hh).reshape(1, 4 * H),          # (1, 4H)
            jnp.asarray(w_out.T),                     # (H, C)
            b_out.reshape(1, -1))                     # (1, C)


@functools.partial(jax.jit, static_argnames=("batch_size", "embedding_dim"))
def lstm_net_forward(sentence, prepped, *, batch_size, embedding_dim):
    """Single-sentence forward. sentence: (T, batch_size*embedding_dim) float32,
    mirroring the .view() done inside the module's forward()."""
    w_ih_t, w_hh_t, b, w_out_t, b_out2 = prepped
    T = sentence.shape[0]
    B, E = batch_size, embedding_dim
    C = w_out_t.shape[1]

    x = sentence.reshape(T * B, E)                    # flatten time*batch for xproj

    kernel = functools.partial(_lstm_net_kernel, seq_len=T, batch=B)
    vmem = lambda: pl.BlockSpec(memory_space=pltpu.MemorySpace.VMEM)
    # Single invocation, no grid: everything resident in VMEM (~40 KiB footprint).
    return pl.pallas_call(
        kernel,
        out_shape=jax.ShapeDtypeStruct((B, C), jnp.float32),
        in_specs=[vmem() for _ in range(6)],
        out_specs=vmem(),
    )(x, w_ih_t, w_hh_t, b, w_out_t, b_out2)


@functools.partial(jax.jit, static_argnames=("batch_size", "embedding_dim"))
def lstm_net_forward_batched(sentences, prepped, *, batch_size, embedding_dim):
    """Amortized path: N independent equal-length sentences in ONE pallas_call.
    sentences: (N, T, batch_size*embedding_dim). The leading grid axis is marked
    'parallel' so v7x's two TensorCores split the sequences; weights are
    grid-invariant and stay resident in VMEM across the grid."""
    w_ih_t, w_hh_t, b, w_out_t, b_out2 = prepped
    N, T = sentences.shape[0], sentences.shape[1]
    B, E = batch_size, embedding_dim
    C = w_out_t.shape[1]

    x = sentences.reshape(N, T * B, E)

    kernel = functools.partial(_lstm_net_kernel, seq_len=T, batch=B)
    inv = lambda shape: pl.BlockSpec(shape, lambda n: (0,) * len(shape))
    return pl.pallas_call(
        kernel,
        out_shape=jax.ShapeDtypeStruct((N, B, C), jnp.float32),
        grid=(N,),
        in_specs=[
            pl.BlockSpec((None, T * B, E), lambda n: (n, 0, 0)),   # per-sentence tile
            inv(w_ih_t.shape), inv(w_hh_t.shape), inv(b.shape),    # grid-invariant
            inv(w_out_t.shape), inv(b_out2.shape),
        ],
        out_specs=pl.BlockSpec((None, B, C), lambda n: (n, 0, 0)),
        compiler_params=pltpu.CompilerParams(
            dimension_semantics=("parallel",)),
    )(x, w_ih_t, w_hh_t, b, w_out_t, b_out2)


def init_params(key, embedding_dim, hidden_dim, target_size):
    """Deterministic init mirroring the module: xavier_normal on matrices, 0 on biases
    (xavier_normal raises ValueError on 1-D params -> constant 0 in the module)."""
    k1, k2, k3 = jax.random.split(key, 3)

    def xavier_normal(k, shape):
        fan_out, fan_in = shape
        std = (2.0 / (fan_in + fan_out)) ** 0.5
        return std * jax.random.normal(k, shape, dtype=jnp.float32)

    w_ih = xavier_normal(k1, (4 * hidden_dim, embedding_dim))
    w_hh = xavier_normal(k2, (4 * hidden_dim, hidden_dim))
    b_ih = jnp.zeros((4 * hidden_dim,), jnp.float32)
    b_hh = jnp.zeros((4 * hidden_dim,), jnp.float32)
    w_out = xavier_normal(k3, (target_size, hidden_dim))
    b_out = jnp.zeros((target_size,), jnp.float32)
    return (w_ih, w_hh, b_ih, b_hh, w_out, b_out)


def _reference_forward(sentence, params, *, batch_size, embedding_dim):
    """Pure-JAX reference (lax.scan) for correctness checking."""
    w_ih, w_hh, b_ih, b_hh, w_out, b_out = params
    T = sentence.shape[0]
    H = w_hh.shape[1]
    x = sentence.reshape(T, batch_size, embedding_dim)

    def step(carry, xt):
        h, c = carry
        gates = xt @ w_ih.T + h @ w_hh.T + b_ih + b_hh
        i = jax.nn.sigmoid(gates[:, 0 * H:1 * H])
        f = jax.nn.sigmoid(gates[:, 1 * H:2 * H])
        g = jnp.tanh(gates[:, 2 * H:3 * H])
        o = jax.nn.sigmoid(gates[:, 3 * H:4 * H])
        c = f * c + i * g
        h = o * jnp.tanh(c)
        return (h, c), h

    h0 = jnp.zeros((batch_size, H), jnp.float32)
    (h_last, _), _ = lax.scan(step, (h0, h0), x)
    logits = h_last @ w_out.T + b_out
    return jax.nn.log_softmax(logits, axis=-1)


if __name__ == "__main__":
    # Small shapes consistent with the module's forward.
    seq_len = 8
    batch_size = 2
    embedding_dim = 16
    hidden_dim = 32
    target_size = 8
    num_sentences = 4

    key = jax.random.PRNGKey(0)
    kp, kx, kxs = jax.random.split(key, 3)
    params = init_params(kp, embedding_dim, hidden_dim, target_size)
    prepped = prepare_params(params)   # one-time layout prep, outside the call path

    # `sentence` as it would be passed to forward() before the .view().
    sentence = jax.random.normal(kx, (seq_len, batch_size * embedding_dim),
                                 dtype=jnp.float32)

    # Single-sentence (no-grid) kernel.
    out = lstm_net_forward(sentence, prepped,
                           batch_size=batch_size, embedding_dim=embedding_dim)
    out = jax.block_until_ready(out)
    ref = _reference_forward(sentence, params,
                             batch_size=batch_size, embedding_dim=embedding_dim)
    assert out.shape == (batch_size, target_size)
    assert jnp.allclose(out, ref, atol=1e-5, rtol=1e-5), "single-sentence mismatch"

    # Batched (grid-parallel) kernel: one launch for many sentences.
    sentences = jax.random.normal(
        kxs, (num_sentences, seq_len, batch_size * embedding_dim), dtype=jnp.float32)
    out_b = lstm_net_forward_batched(sentences, prepped,
                                     batch_size=batch_size,
                                     embedding_dim=embedding_dim)
    out_b = jax.block_until_ready(out_b)
    ref_b = jnp.stack([
        _reference_forward(s, params, batch_size=batch_size,
                           embedding_dim=embedding_dim) for s in sentences])
    assert out_b.shape == (num_sentences, batch_size, target_size)
    assert jnp.allclose(out_b, ref_b, atol=1e-5, rtol=1e-5), "batched mismatch"

    print("KERNEL_OK")
</pallas_src>

<mosaic_0001>
module attributes {stable_mosaic.version = 11 : i64} {
  func.func @_lstm_net_kernel(%arg0: memref<16x16xf32, #tpu.memory_space<vmem>>, %arg1: memref<16x128xf32, #tpu.memory_space<vmem>>, %arg2: memref<32x128xf32, #tpu.memory_space<vmem>>, %arg3: memref<1x128xf32, #tpu.memory_space<vmem>>, %arg4: memref<32x8xf32, #tpu.memory_space<vmem>>, %arg5: memref<1x8xf32, #tpu.memory_space<vmem>>, %arg6: memref<2x8xf32, #tpu.memory_space<vmem>>) attributes {dimension_semantics = [], scalar_prefetch = 0 : i64, scratch_operands = 0 : i64, tpu.core_type = #tpu.core_type<tc>} {
    %c0 = arith.constant 0 : index
    %c0_0 = arith.constant 0 : index
    %0 = vector.load %arg2[%c0, %c0_0] : memref<32x128xf32, #tpu.memory_space<vmem>>, vector<32x128xf32>
    %c0_1 = arith.constant 0 : index
    %c0_2 = arith.constant 0 : index
    %1 = vector.load %arg0[%c0_1, %c0_2] : memref<16x16xf32, #tpu.memory_space<vmem>>, vector<16x16xf32>
    %c0_3 = arith.constant 0 : index
    %c0_4 = arith.constant 0 : index
    %2 = vector.load %arg1[%c0_3, %c0_4] : memref<16x128xf32, #tpu.memory_space<vmem>>, vector<16x128xf32>
    %cst = arith.constant dense<0.000000e+00> : vector<16x128xf32>
    %3 = tpu.matmul %1, %2, %cst {dimension_numbers = #tpu.dot_dimension_numbers<[1], [0], [0], [1], [0, 0, 1, 1], [], []>} : vector<16x16xf32>, vector<16x128xf32>, vector<16x128xf32> -> vector<16x128xf32>
    %c0_5 = arith.constant 0 : index
    %c0_6 = arith.constant 0 : index
    %4 = vector.load %arg3[%c0_5, %c0_6] : memref<1x128xf32, #tpu.memory_space<vmem>>, vector<1x128xf32>
    %5 = vector.broadcast %4 : vector<1x128xf32> to vector<16x128xf32>
    %6 = arith.addf %3, %5 : vector<16x128xf32>
    %cst_7 = arith.constant 0.000000e+00 : f32
    %7 = vector.broadcast %cst_7 : f32 to vector<2x32xf32>
    %cst_8 = arith.constant 0.000000e+00 : f32
    %8 = vector.broadcast %cst_8 : f32 to vector<2x32xf32>
    %9 = vector.extract_strided_slice %6 {offsets = [0, 0], sizes = [2, 128], strides = [1, 1]} : vector<16x128xf32> to vector<2x128xf32>
    %cst_9 = arith.constant dense<0.000000e+00> : vector<2x128xf32>
    %10 = tpu.matmul %7, %0, %cst_9 {dimension_numbers = #tpu.dot_dimension_numbers<[1], [0], [0], [1], [0, 0, 1, 1], [], []>} : vector<2x32xf32>, vector<32x128xf32>, vector<2x128xf32> -> vector<2x128xf32>
    %11 = arith.addf %9, %10 : vector<2x128xf32>
    %12 = arith.negf %11 : vector<2x128xf32>
    %13 = math.exp %12 : vector<2x128xf32>
    %cst_10 = arith.constant 1.000000e+00 : f32
    %14 = vector.broadcast %cst_10 : f32 to vector<2x128xf32>
    %15 = arith.addf %14, %13 : vector<2x128xf32>
    %16 = arith.divf %14, %15 : vector<2x128xf32>
    %17 = math.tanh %11 : vector<2x128xf32>
    %18 = vector.extract_strided_slice %16 {offsets = [0, 0], sizes = [2, 32], strides = [1, 1]} : vector<2x128xf32> to vector<2x32xf32>
    %19 = vector.extract_strided_slice %16 {offsets = [0, 32], sizes = [2, 32], strides = [1, 1]} : vector<2x128xf32> to vector<2x32xf32>
    %20 = vector.extract_strided_slice %17 {offsets = [0, 64], sizes = [2, 32], strides = [1, 1]} : vector<2x128xf32> to vector<2x32xf32>
    %21 = vector.extract_strided_slice %16 {offsets = [0, 96], sizes = [2, 32], strides = [1, 1]} : vector<2x128xf32> to vector<2x32xf32>
    %22 = arith.mulf %19, %8 : vector<2x32xf32>
    %23 = arith.mulf %18, %20 : vector<2x32xf32>
    %24 = arith.addf %22, %23 : vector<2x32xf32>
    %25 = math.tanh %24 : vector<2x32xf32>
    %26 = arith.mulf %21, %25 : vector<2x32xf32>
    %27 = vector.extract_strided_slice %6 {offsets = [2, 0], sizes = [2, 128], strides = [1, 1]} : vector<16x128xf32> to vector<2x128xf32>
    %cst_11 = arith.constant dense<0.000000e+00> : vector<2x128xf32>
    %28 = tpu.matmul %26, %0, %cst_11 {dimension_numbers = #tpu.dot_dimension_numbers<[1], [0], [0], [1], [0, 0, 1, 1], [], []>} : vector<2x32xf32>, vector<32x128xf32>, vector<2x128xf32> -> vector<2x128xf32>
    %29 = arith.addf %27, %28 : vector<2x128xf32>
    %30 = arith.negf %29 : vector<2x128xf32>
    %31 = math.exp %30 : vector<2x128xf32>
    %cst_12 = arith.constant 1.000000e+00 : f32
    %32 = vector.broadcast %cst_12 : f32 to vector<2x128xf32>
    %33 = arith.addf %32, %31 : vector<2x128xf32>
    %34 = arith.divf %32, %33 : vector<2x128xf32>
    %35 = math.tanh %29 : vector<2x128xf32>
    %36 = vector.extract_strided_slice %34 {offsets = [0, 0], sizes = [2, 32], strides = [1, 1]} : vector<2x128xf32> to vector<2x32xf32>
    %37 = vector.extract_strided_slice %34 {offsets = [0, 32], sizes = [2, 32], strides = [1, 1]} : vector<2x128xf32> to vector<2x32xf32>
    %38 = vector.extract_strided_slice %35 {offsets = [0, 64], sizes = [2, 32], strides = [1, 1]} : vector<2x128xf32> to vector<2x32xf32>
    %39 = vector.extract_strided_slice %34 {offsets = [0, 96], sizes = [2, 32], strides = [1, 1]} : vector<2x128xf32> to vector<2x32xf32>
    %40 = arith.mulf %37, %24 : vector<2x32xf32>
    %41 = arith.mulf %36, %38 : vector<2x32xf32>
    %42 = arith.addf %40, %41 : vector<2x32xf32>
    %43 = math.tanh %42 : vector<2x32xf32>
    %44 = arith.mulf %39, %43 : vector<2x32xf32>
    %45 = vector.extract_strided_slice %6 {offsets = [4, 0], sizes = [2, 128], strides = [1, 1]} : vector<16x128xf32> to vector<2x128xf32>
    %cst_13 = arith.constant dense<0.000000e+00> : vector<2x128xf32>
    %46 = tpu.matmul %44, %0, %cst_13 {dimension_numbers = #tpu.dot_dimension_numbers<[1], [0], [0], [1], [0, 0, 1, 1], [], []>} : vector<2x32xf32>, vector<32x128xf32>, vector<2x128xf32> -> vector<2x128xf32>
    %47 = arith.addf %45, %46 : vector<2x128xf32>
    %48 = arith.negf %47 : vector<2x128xf32>
    %49 = math.exp %48 : vector<2x128xf32>
    %cst_14 = arith.constant 1.000000e+00 : f32
    %50 = vector.broadcast %cst_14 : f32 to vector<2x128xf32>
    %51 = arith.addf %50, %49 : vector<2x128xf32>
    %52 = arith.divf %50, %51 : vector<2x128xf32>
    %53 = math.tanh %47 : vector<2x128xf32>
    %54 = vector.extract_strided_slice %52 {offsets = [0, 0], sizes = [2, 32], strides = [1, 1]} : vector<2x128xf32> to vector<2x32xf32>
    %55 = vector.extract_strided_slice %52 {offsets = [0, 32], sizes = [2, 32], strides = [1, 1]} : vector<2x128xf32> to vector<2x32xf32>
    %56 = vector.extract_strided_slice %53 {offsets = [0, 64], sizes = [2, 32], strides = [1, 1]} : vector<2x128xf32> to vector<2x32xf32>
    %57 = vector.extract_strided_slice %52 {offsets = [0, 96], sizes = [2, 32], strides = [1, 1]} : vector<2x128xf32> to vector<2x32xf32>
    %58 = arith.mulf %55, %42 : vector<2x32xf32>
    %59 = arith.mulf %54, %56 : vector<2x32xf32>
    %60 = arith.addf %58, %59 : vector<2x32xf32>
    %61 = math.tanh %60 : vector<2x32xf32>
    %62 = arith.mulf %57, %61 : vector<2x32xf32>
    %63 = vector.extract_strided_slice %6 {offsets = [6, 0], sizes = [2, 128], strides = [1, 1]} : vector<16x128xf32> to vector<2x128xf32>
    %cst_15 = arith.constant dense<0.000000e+00> : vector<2x128xf32>
    %64 = tpu.matmul %62, %0, %cst_15 {dimension_numbers = #tpu.dot_dimension_numbers<[1], [0], [0], [1], [0, 0, 1, 1], [], []>} : vector<2x32xf32>, vector<32x128xf32>, vector<2x128xf32> -> vector<2x128xf32>
    %65 = arith.addf %63, %64 : vector<2x128xf32>
    %66 = arith.negf %65 : vector<2x128xf32>
    %67 = math.exp %66 : vector<2x128xf32>
    %cst_16 = arith.constant 1.000000e+00 : f32
    %68 = vector.broadcast %cst_16 : f32 to vector<2x128xf32>
    %69 = arith.addf %68, %67 : vector<2x128xf32>
    %70 = arith.divf %68, %69 : vector<2x128xf32>
    %71 = math.tanh %65 : vector<2x128xf32>
    %72 = vector.extract_strided_slice %70 {offsets = [0, 0], sizes = [2, 32], strides = [1, 1]} : vector<2x128xf32> to vector<2x32xf32>
    %73 = vector.extract_strided_slice %70 {offsets = [0, 32], sizes = [2, 32], strides = [1, 1]} : vector<2x128xf32> to vector<2x32xf32>
    %74 = vector.extract_strided_slice %71 {offsets = [0, 64], sizes = [2, 32], strides = [1, 1]} : vector<2x128xf32> to vector<2x32xf32>
    %75 = vector.extract_strided_slice %70 {offsets = [0, 96], sizes = [2, 32], strides = [1, 1]} : vector<2x128xf32> to vector<2x32xf32>
    %76 = arith.mulf %73, %60 : vector<2x32xf32>
    %77 = arith.mulf %72, %74 : vector<2x32xf32>
    %78 = arith.addf %76, %77 : vector<2x32xf32>
    %79 = math.tanh %78 : vector<2x32xf32>
    %80 = arith.mulf %75, %79 : vector<2x32xf32>
    %81 = vector.extract_strided_slice %6 {offsets = [8, 0], sizes = [2, 128], strides = [1, 1]} : vector<16x128xf32> to vector<2x128xf32>
    %cst_17 = arith.constant dense<0.000000e+00> : vector<2x128xf32>
    %82 = tpu.matmul %80, %0, %cst_17 {dimension_numbers = #tpu.dot_dimension_numbers<[1], [0], [0], [1], [0, 0, 1, 1], [], []>} : vector<2x32xf32>, vector<32x128xf32>, vector<2x128xf32> -> vector<2x128xf32>
    %83 = arith.addf %81, %82 : vector<2x128xf32>
    %84 = arith.negf %83 : vector<2x128xf32>
    %85 = math.exp %84 : vector<2x128xf32>
    %cst_18 = arith.constant 1.000000e+00 : f32
    %86 = vector.broadcast %cst_18 : f32 to vector<2x128xf32>
    %87 = arith.addf %86, %85 : vector<2x128xf32>
    %88 = arith.divf %86, %87 : vector<2x128xf32>
    %89 = math.tanh %83 : vector<2x128xf32>
    %90 = vector.extract_strided_slice %88 {offsets = [0, 0], sizes = [2, 32], strides = [1, 1]} : vector<2x128xf32> to vector<2x32xf32>
    %91 = vector.extract_strided_slice %88 {offsets = [0, 32], sizes = [2, 32], strides = [1, 1]} : vector<2x128xf32> to vector<2x32xf32>
    %92 = vector.extract_strided_slice %89 {offsets = [0, 64], sizes = [2, 32], strides = [1, 1]} : vector<2x128xf32> to vector<2x32xf32>
    %93 = vector.extract_strided_slice %88 {offsets = [0, 96], sizes = [2, 32], strides = [1, 1]} : vector<2x128xf32> to vector<2x32xf32>
    %94 = arith.mulf %91, %78 : vector<2x32xf32>
    %95 = arith.mulf %90, %92 : vector<2x32xf32>
    %96 = arith.addf %94, %95 : vector<2x32xf32>
    %97 = math.tanh %96 : vector<2x32xf32>
    %98 = arith.mulf %93, %97 : vector<2x32xf32>
    %99 = vector.extract_strided_slice %6 {offsets = [10, 0], sizes = [2, 128], strides = [1, 1]} : vector<16x128xf32> to vector<2x128xf32>
    %cst_19 = arith.constant dense<0.000000e+00> : vector<2x128xf32>
    %100 = tpu.matmul %98, %0, %cst_19 {dimension_numbers = #tpu.dot_dimension_numbers<[1], [0], [0], [1], [0, 0, 1, 1], [], []>} : vector<2x32xf32>, vector<32x128xf32>, vector<2x128xf32> -> vector<2x128xf32>
    %101 = arith.addf %99, %100 : vector<2x128xf32>
    %102 = arith.negf %101 : vector<2x128xf32>
    %103 = math.exp %102 : vector<2x128xf32>
    %cst_20 = arith.constant 1.000000e+00 : f32
    %104 = vector.broadcast %cst_20 : f32 to vector<2x128xf32>
    %105 = arith.addf %104, %103 : vector<2x128xf32>
    %106 = arith.divf %104, %105 : vector<2x128xf32>
    %107 = math.tanh %101 : vector<2x128xf32>
    %108 = vector.extract_strided_slice %106 {offsets = [0, 0], sizes = [2, 32], strides = [1, 1]} : vector<2x128xf32> to vector<2x32xf32>
    %109 = vector.extract_strided_slice %106 {offsets = [0, 32], sizes = [2, 32], strides = [1, 1]} : vector<2x128xf32> to vector<2x32xf32>
    %110 = vector.extract_strided_slice %107 {offsets = [0, 64], sizes = [2, 32], strides = [1, 1]} : vector<2x128xf32> to vector<2x32xf32>
    %111 = vector.extract_strided_slice %106 {offsets = [0, 96], sizes = [2, 32], strides = [1, 1]} : vector<2x128xf32> to vector<2x32xf32>
    %112 = arith.mulf %109, %96 : vector<2x32xf32>
    %113 = arith.mulf %108, %110 : vector<2x32xf32>
    %114 = arith.addf %112, %113 : vector<2x32xf32>
    %115 = math.tanh %114 : vector<2x32xf32>
    %116 = arith.mulf %111, %115 : vector<2x32xf32>
    %117 = vector.extract_strided_slice %6 {offsets = [12, 0], sizes = [2, 128], strides = [1, 1]} : vector<16x128xf32> to vector<2x128xf32>
    %cst_21 = arith.constant dense<0.000000e+00> : vector<2x128xf32>
    %118 = tpu.matmul %116, %0, %cst_21 {dimension_numbers = #tpu.dot_dimension_numbers<[1], [0], [0], [1], [0, 0, 1, 1], [], []>} : vector<2x32xf32>, vector<32x128xf32>, vector<2x128xf32> -> vector<2x128xf32>
    %119 = arith.addf %117, %118 : vector<2x128xf32>
    %120 = arith.negf %119 : vector<2x128xf32>
    %121 = math.exp %120 : vector<2x128xf32>
    %cst_22 = arith.constant 1.000000e+00 : f32
    %122 = vector.broadcast %cst_22 : f32 to vector<2x128xf32>
    %123 = arith.addf %122, %121 : vector<2x128xf32>
    %124 = arith.divf %122, %123 : vector<2x128xf32>
    %125 = math.tanh %119 : vector<2x128xf32>
    %126 = vector.extract_strided_slice %124 {offsets = [0, 0], sizes = [2, 32], strides = [1, 1]} : vector<2x128xf32> to vector<2x32xf32>
    %127 = vector.extract_strided_slice %124 {offsets = [0, 32], sizes = [2, 32], strides = [1, 1]} : vector<2x128xf32> to vector<2x32xf32>
    %128 = vector.extract_strided_slice %125 {offsets = [0, 64], sizes = [2, 32], strides = [1, 1]} : vector<2x128xf32> to vector<2x32xf32>
    %129 = vector.extract_strided_slice %124 {offsets = [0, 96], sizes = [2, 32], strides = [1, 1]} : vector<2x128xf32> to vector<2x32xf32>
    %130 = arith.mulf %127, %114 : vector<2x32xf32>
    %131 = arith.mulf %126, %128 : vector<2x32xf32>
    %132 = arith.addf %130, %131 : vector<2x32xf32>
    %133 = math.tanh %132 : vector<2x32xf32>
    %134 = arith.mulf %129, %133 : vector<2x32xf32>
    %135 = vector.extract_strided_slice %6 {offsets = [14, 0], sizes = [2, 128], strides = [1, 1]} : vector<16x128xf32> to vector<2x128xf32>
    %cst_23 = arith.constant dense<0.000000e+00> : vector<2x128xf32>
    %136 = tpu.matmul %134, %0, %cst_23 {dimension_numbers = #tpu.dot_dimension_numbers<[1], [0], [0], [1], [0, 0, 1, 1], [], []>} : vector<2x32xf32>, vector<32x128xf32>, vector<2x128xf32> -> vector<2x128xf32>
    %137 = arith.addf %135, %136 : vector<2x128xf32>
    %138 = arith.negf %137 : vector<2x128xf32>
    %139 = math.exp %138 : vector<2x128xf32>
    %cst_24 = arith.constant 1.000000e+00 : f32
    %140 = vector.broadcast %cst_24 : f32 to vector<2x128xf32>
    %141 = arith.addf %140, %139 : vector<2x128xf32>
    %142 = arith.divf %140, %141 : vector<2x128xf32>
    %143 = math.tanh %137 : vector<2x128xf32>
    %144 = vector.extract_strided_slice %142 {offsets = [0, 0], sizes = [2, 32], strides = [1, 1]} : vector<2x128xf32> to vector<2x32xf32>
    %145 = vector.extract_strided_slice %142 {offsets = [0, 32], sizes = [2, 32], strides = [1, 1]} : vector<2x128xf32> to vector<2x32xf32>
    %146 = vector.extract_strided_slice %143 {offsets = [0, 64], sizes = [2, 32], strides = [1, 1]} : vector<2x128xf32> to vector<2x32xf32>
    %147 = vector.extract_strided_slice %142 {offsets = [0, 96], sizes = [2, 32], strides = [1, 1]} : vector<2x128xf32> to vector<2x32xf32>
    %148 = arith.mulf %145, %132 : vector<2x32xf32>
    %149 = arith.mulf %144, %146 : vector<2x32xf32>
    %150 = arith.addf %148, %149 : vector<2x32xf32>
    %151 = math.tanh %150 : vector<2x32xf32>
    %152 = arith.mulf %147, %151 : vector<2x32xf32>
    %c0_25 = arith.constant 0 : index
    %c0_26 = arith.constant 0 : index
    %153 = vector.load %arg4[%c0_25, %c0_26] : memref<32x8xf32, #tpu.memory_space<vmem>>, vector<32x8xf32>
    %cst_27 = arith.constant dense<0.000000e+00> : vector<2x8xf32>
    %154 = tpu.matmul %152, %153, %cst_27 {dimension_numbers = #tpu.dot_dimension_numbers<[1], [0], [0], [1], [0, 0, 1, 1], [], []>} : vector<2x32xf32>, vector<32x8xf32>, vector<2x8xf32> -> vector<2x8xf32>
    %c0_28 = arith.constant 0 : index
    %c0_29 = arith.constant 0 : index
    %155 = vector.load %arg5[%c0_28, %c0_29] : memref<1x8xf32, #tpu.memory_space<vmem>>, vector<1x8xf32>
    %156 = vector.broadcast %155 : vector<1x8xf32> to vector<2x8xf32>
    %157 = arith.addf %154, %156 : vector<2x8xf32>
    %cst_30 = arith.constant dense<0xFF800000> : vector<2xf32>
    %158 = vector.multi_reduction <maximumf>, %157, %cst_30 [1] : vector<2x8xf32> to vector<2xf32>
    %159 = vector.shape_cast %158 : vector<2xf32> to vector<2x1xf32>
    %160 = vector.broadcast %159 : vector<2x1xf32> to vector<2x8xf32>
    %161 = arith.subf %157, %160 : vector<2x8xf32>
    %162 = math.exp %161 : vector<2x8xf32>
    %cst_31 = arith.constant dense<0.000000e+00> : vector<2xf32>
    %163 = vector.multi_reduction <add>, %162, %cst_31 [1] : vector<2x8xf32> to vector<2xf32>
    %164 = vector.shape_cast %163 : vector<2xf32> to vector<2x1xf32>
    %165 = math.log %164 : vector<2x1xf32>
    %166 = vector.broadcast %165 : vector<2x1xf32> to vector<2x8xf32>
    %167 = arith.subf %161, %166 : vector<2x8xf32>
    %c0_32 = arith.constant 0 : index
    %c0_33 = arith.constant 0 : index
    %168 = vector.load %arg6[%c0_32, %c0_33] : memref<2x8xf32, #tpu.memory_space<vmem>>, vector<2x8xf32>
    tpu.vector_store %arg6[%c0_32, %c0_33], %167 {strides = array<i32>} : memref<2x8xf32, #tpu.memory_space<vmem>>, vector<2x8xf32>,
    return
  }
}

</mosaic_0001>

<bundles_post_ra>
// kernel: lstm_net_forward.1
= control target key start
LH: loop header
LB: loop body
LE: loop exit
PB: predicated region body
PF: predicated region fallthrough
CT: control target
= control target key end

     0   :  { %vm39_vm0 = vcmask 130048   ;;  %v1410_v3 = vmov 0.0|0.0   ;;  %vm1411_vm1 = vmmov 0   ;;  %v1412_v10 = vmov 0.0   ;;  %s1619_s0 = inlined_call_operand.vmem [shape: f32[16,16], index: 0, kind: input, shape index: {}]   ;;  %s1620_s1 = inlined_call_operand.vmem [shape: f32[16,128], index: 1, kind: input, shape index: {}]   ;;  %s1621_s2 = inlined_call_operand.vmem [shape: f32[32,128], index: 2, kind: input, shape index: {}]   ;;  %s1622_s3 = inlined_call_operand.vmem [shape: f32[1,128], index: 3, kind: input, shape index: {}]   ;;  %s1623_s4 = inlined_call_operand.vmem [shape: f32[32,8], index: 4, kind: input, shape index: {}]   ;;  %s1624_s5 = inlined_call_operand.vmem [shape: f32[1,8], index: 5, kind: input, shape index: {}]   ;;  %s1625_s6 = inlined_call_operand.hbm [shape: f32[2,8], index: 6, kind: output, shape index: {}]  }
   0x1   :  { %v30_v0 = vld [vmem:[%s1620_s1] sm:$0xff]  ;;  %v31_v1 = vld [vmem:[%s1620_s1 + $0x8] sm:$0xff]  ;;  %1258 = vmatprep.subr.bf16.mxu1 %v1410_v3  ;;  %v26_v8 = vld [vmem:[%s1621_s2 + $0x10] sm:$0xff]  ;;  %1163 = vmatprep.mubr.msk.f32.mxu1 %vm1411_vm1, %v1412_v10 }
   0x2   :  { %v24_v2 = vld [vmem:[%s1621_s2] sm:$0xff]  ;;  %v1254_v4 = vpack.c.bf16 %v31_v1, %v30_v0  ;;  %v25_v5 = vld [vmem:[%s1621_s2 + $0x8] sm:$0xff]  ;;  %v27_v9 = vld [vmem:[%s1621_s2 + $0x18] sm:$0xff] }
   0x3   :  { %v28_v6 = vld [vmem:[%s1619_s0] sm:$0xff]  ;;  %v1467_v7 = vpack.c.bf16 %v25_v5, %v24_v2 }
   0x4   :  { %1152 = vmatprep.mubr.msk.f32.mxu0 %vm39_vm0, %v28_v6 }
   0x5   :  { %11 = vsyncpa [#allocation3], 0  ;;  %1255 = vmatprep.subr.bf16.mxu0 %v1254_v4  ;;  %1260 = vmatpush3.bf16.msra.mxu1 %v1467_v7  ;;  %v29_v11 = vld [vmem:[%s1619_s0 + $0x8] sm:$0xff]  ;;  %v1482_v12 = vpack.c.bf16 %v27_v9, %v26_v8  ;;  %v1079_v13 = vld [vmem:[%s1622_s3] ss:$0 sm:$0xff]  ;;  %s1413_s12 = smov 64  }
   0x6   :  { %1257 = vmatpush3.bf16.msra.mxu0 %v1254_v4  ;;  %1261 = vmatprep.subr.bf16.mxu1 %v1410_v3  ;;  %s1414_s3 = smov 32   ;;  %vm121_vm2 = vcmask 261120   ;;  %vm1051_vm3 = vcmask 58368  }
   0x7   :  { %1264 = vmatprep.subr.bf16.mxu0 %v1410_v3 }
   0x9   :  { %1153 = vmatmul.mubr.msk.f32.vlgmr.msra.gmra.mrb[0].mxu0 %vm39_vm0, %v29_v11  ;;  %1263 = vmatpush3.bf16.msra.mxu1 %v1482_v12 }
   0xa   :  { %1266 = vmatpush3.bf16.msra.mxu0 %v1467_v7  ;;  %1174 = vmatprep.mubr.msk.f32.mxu0 %vm1411_vm1, %v1412_v10 }
   0xb   :  { %1267 = vmatprep.subr.bf16.mxu0 %v1410_v3  ;;  %1270 = vmatprep.subr.bf16.mxu1 %v1410_v3 }
   0xc   :  { %1164 = vmatmul.mubr.f32.vlgmr.msra.gmra.mrb[0].mxu1 %v1412_v10 }
   0xd   :  { %1272 = vmatpush3.bf16.msra.mxu1 %v1467_v7  ;;  %1185 = vmatprep.mubr.msk.f32.mxu1 %vm1411_vm1, %v1412_v10 }
   0xe   :  { %1269 = vmatpush3.bf16.msra.mxu0 %v1482_v12  ;;  %1273 = vmatprep.subr.bf16.mxu1 %v1410_v3 }
   0xf   :  { %1276 = vmatprep.subr.bf16.mxu0 %v1410_v3 }
  0x11   :  { %1275 = vmatpush3.bf16.msra.mxu1 %v1482_v12 }
  0x12   :  { %1282 = vmatprep.subr.bf16.mxu1 %v1410_v3 }
  0xdc   :  { %v1154_v14 = vpop.f32.mrb[0].mxu0 }
  0xdd   :  { %v1505_v15 = vadd.f32 %v1154_v14, %v1079_v13  ;;  %v112_v16 = vpop.f32.mrb[1].mxu0 }
  0xde   :  { %v1507_v17 = vadd.f32 %v1079_v13, %v112_v16 }
  0xdf   :  { %v191_v18 = vpop.f32.mrb[0].mxu1 }
  0xe0   :  { %v195_v19 = vadd.f32 %v191_v18, %v1507_v17  ;;  %v1165_v20 = vpop.f32.mrb[1].mxu1 }
  0xe2   :  { %1318 = vtanh.f32 %v195_v19  ;;  %v1082_v22 = vmul.f32 -1.442695, %v195_v19 }
  0xe4   :  { %1320 = vpow2.f32 %v1082_v22 }
  0xec   :  { %v1319_v21 = vpop.eup %1318 }
  0xed   :  { %205 = vrot.lane.b32.xlu0 %v1319_v21, %s1413_s12 }
  0xee   :  { %v1321_v23 = vpop.eup %1320 }
  0xef   :  { %v199_v24 = vadd.f32 1.0, %v1321_v23 }
  0xf1   :  { %1322 = vrcp.f32 %v199_v24 }
  0xfb   :  { %v1323_v25 = vpop.eup %1322 }
  0xfc   :  { %v203_v28 = vmul.f32 0.0, %v1323_v25 }
 0x15f   :  { %v206_v26 = vpop.permute.xlu0 %205 }
 0x160   :  { %v208_v27 = vmul.f32 %v1323_v25, %v206_v26 }
 0x162   :  { %210 = vrot.lane.b32.xlu0 %v208_v27, %s1414_s3 }
 0x1d4   :  { %v211_v29 = vpop.permute.xlu0 %210 }
 0x1d5   :  { %v213_v30 = vadd.f32 %v211_v29, %v203_v28 }
 0x1d7   :  { %1324 = vtanh.f32 %v213_v30  ;;  %v307_v46 = vrot.slane %v213_v30, 6 }
 0x1e1   :  { %v1325_v31 = vpop.eup %1324 }
 0x1e2   :  { %216 = vrot.lane.b32.xlu1 %v1325_v31, %s1413_s12 }
 0x254   :  { %v217_v32 = vpop.permute.xlu1 %216 }
 0x255   :  { %v219_v33 = vmul.f32 %v1323_v25, %v217_v32 }
 0x257   :  { %221 = vrot.lane.b32.xlu1 %v219_v33, %s1414_s3 }
 0x2c9   :  { %v222_v34 = vpop.permute.xlu1 %221 }
 0x2ca   :  { %1175 = vmatmul.mubr.msk.f32.vlgmr.msra.gmra.mrb[2].mxu0 %vm121_vm2, %v222_v34 }
 0x2cb   :  { %1278 = vmatpush3.bf16.msra.mxu0 %v1467_v7  ;;  %1196 = vmatprep.mubr.msk.f32.mxu0 %vm1411_vm1, %v1412_v10 }
 0x2cc   :  { %1279 = vmatprep.subr.bf16.mxu0 %v1410_v3 }
 0x2cf   :  { %1281 = vmatpush3.bf16.msra.mxu0 %v1482_v12 }
 0x2d0   :  { %1288 = vmatprep.subr.bf16.mxu0 %v1410_v3 }
 0x39d   :  { %v291_v35 = vpop.f32.mrb[2].mxu0 }
 0x39e   :  { %v296_v36 = vrot.slane %v291_v35, 6  ;;  %v1176_v37 = vpop.f32.mrb[3].mxu0 }
 0x3a0   :  { %v298_v38 = vadd.f32 %v296_v36, %v1507_v17 }
 0x3a2   :  { %1326 = vtanh.f32 %v298_v38  ;;  %v1084_v40 = vmul.f32 -1.442695, %v298_v38 }
 0x3a4   :  { %1328 = vpow2.f32 %v1084_v40 }
 0x3ac   :  { %v1327_v39 = vpop.eup %1326 }
 0x3ad   :  { %311 = vrot.lane.b32.xlu0 %v1327_v39, %s1413_s12 }
 0x3ae   :  { %v1329_v41 = vpop.eup %1328 }
 0x3af   :  { %v302_v42 = vadd.f32 1.0, %v1329_v41 }
 0x3b1   :  { %1330 = vrcp.f32 %v302_v42 }
 0x3bb   :  { %v1331_v43 = vpop.eup %1330 }
 0x3bc   :  { %v309_v47 = vmul.f32 %v1331_v43, %v307_v46 }
 0x41f   :  { %v312_v44 = vpop.permute.xlu0 %311 }
 0x420   :  { %v314_v45 = vmul.f32 %v1331_v43, %v312_v44 }
 0x422   :  { %316 = vrot.lane.b32.xlu1 %v314_v45, %s1414_s3 }
 0x494   :  { %v317_v48 = vpop.permute.xlu1 %316 }
 0x495   :  { %v319_v49 = vadd.f32 %v317_v48, %v309_v47 }
 0x497   :  { %1332 = vtanh.f32 %v319_v49  ;;  %v414_v2 = vrot.slane %v319_v49, 6 }
 0x4a1   :  { %v1333_v50 = vpop.eup %1332 }
 0x4a2   :  { %322 = vrot.lane.b32.xlu0 %v1333_v50, %s1413_s12 }
 0x514   :  { %v323_v51 = vpop.permute.xlu0 %322 }
 0x515   :  { %v325_v52 = vmul.f32 %v1331_v43, %v323_v51 }
 0x517   :  { %v327_v53 = vrot.slane %v325_v52, 2 }
 0x519   :  { %328 = vrot.lane.b32.xlu1 %v327_v53, %s1414_s3 }
 0x58b   :  { %v329_v54 = vpop.permute.xlu1 %328 }
 0x58c   :  { %1186 = vmatmul.mubr.msk.f32.vlgmr.msra.gmra.mrb[2].mxu1 %vm121_vm2, %v329_v54 }
 0x58d   :  { %1284 = vmatpush3.bf16.msra.mxu1 %v1467_v7  ;;  %1207 = vmatprep.mubr.msk.f32.mxu1 %vm1411_vm1, %v1412_v10 }
 0x58e   :  { %1285 = vmatprep.subr.bf16.mxu1 %v1410_v3 }
 0x591   :  { %1287 = vmatpush3.bf16.msra.mxu1 %v1482_v12 }
 0x592   :  { %1294 = vmatprep.subr.bf16.mxu1 %v1410_v3 }
 0x65f   :  { %v398_v55 = vpop.f32.mrb[2].mxu1 }
 0x660   :  { %v403_v56 = vrot.slane %v398_v55, 4  ;;  %v1187_v57 = vpop.f32.mrb[3].mxu1 }
 0x662   :  { %v405_v58 = vadd.f32 %v403_v56, %v1507_v17 }
 0x664   :  { %1334 = vtanh.f32 %v405_v58  ;;  %v1086_v60 = vmul.f32 -1.442695, %v405_v58 }
 0x666   :  { %1336 = vpow2.f32 %v1086_v60 }
 0x66e   :  { %v1335_v59 = vpop.eup %1334 }
 0x66f   :  { %418 = vrot.lane.b32.xlu0 %v1335_v59, %s1413_s12 }
 0x670   :  { %v1337_v61 = vpop.eup %1336 }
 0x671   :  { %v409_v62 = vadd.f32 1.0, %v1337_v61 }
 0x673   :  { %1338 = vrcp.f32 %v409_v62 }
 0x67d   :  { %v1339_v63 = vpop.eup %1338 }
 0x67e   :  { %v416_v4 = vmul.f32 %v1339_v63, %v414_v2 }
 0x6e1   :  { %v419_v0 = vpop.permute.xlu0 %418 }
 0x6e2   :  { %v421_v1 = vmul.f32 %v1339_v63, %v419_v0 }
 0x6e4   :  { %423 = vrot.lane.b32.xlu1 %v421_v1, %s1414_s3 }
 0x756   :  { %v424_v5 = vpop.permute.xlu1 %423 }
 0x757   :  { %v426_v6 = vadd.f32 %v424_v5, %v416_v4 }
 0x759   :  { %1340 = vtanh.f32 %v426_v6  ;;  %v521_v28 = vrot.slane %v426_v6, 6 }
 0x763   :  { %v1341_v8 = vpop.eup %1340 }
 0x764   :  { %429 = vrot.lane.b32.xlu0 %v1341_v8, %s1413_s12 }
 0x7d6   :  { %v430_v9 = vpop.permute.xlu0 %429 }
 0x7d7   :  { %v432_v11 = vmul.f32 %v1339_v63, %v430_v9 }
 0x7d9   :  { %v434_v13 = vrot.slane %v432_v11, 4 }
 0x7db   :  { %435 = vrot.lane.b32.xlu1 %v434_v13, %s1414_s3 }
 0x84d   :  { %v436_v14 = vpop.permute.xlu1 %435 }
 0x84e   :  { %1197 = vmatmul.mubr.msk.f32.vlgmr.msra.gmra.mrb[4].mxu0 %vm121_vm2, %v436_v14 }
 0x84f   :  { %1290 = vmatpush3.bf16.msra.mxu0 %v1467_v7  ;;  %1218 = vmatprep.mubr.msk.f32.mxu0 %vm1411_vm1, %v1412_v10 }
 0x850   :  { %1291 = vmatprep.subr.bf16.mxu0 %v1410_v3 }
 0x853   :  { %1293 = vmatpush3.bf16.msra.mxu0 %v1482_v12 }
 0x854   :  { %1300 = vmatprep.subr.bf16.mxu0 %v1410_v3 }
 0x921   :  { %v505_v16 = vpop.f32.mrb[4].mxu0 }
 0x922   :  { %v510_v18 = vrot.slane %v505_v16, 2  ;;  %v1198_v19 = vpop.f32.mrb[5].mxu0 }
 0x924   :  { %v512_v20 = vadd.f32 %v510_v18, %v1507_v17 }
 0x926   :  { %1342 = vtanh.f32 %v512_v20  ;;  %v1088_v22 = vmul.f32 -1.442695, %v512_v20 }
 0x928   :  { %1344 = vpow2.f32 %v1088_v22 }
 0x930   :  { %v1343_v21 = vpop.eup %1342 }
 0x931   :  { %525 = vrot.lane.b32.xlu0 %v1343_v21, %s1413_s12 }
 0x932   :  { %v1345_v23 = vpop.eup %1344 }
 0x933   :  { %v516_v24 = vadd.f32 1.0, %v1345_v23 }
 0x935   :  { %1346 = vrcp.f32 %v516_v24 }
 0x93f   :  { %v1347_v25 = vpop.eup %1346 }
 0x940   :  { %v523_v29 = vmul.f32 %v1347_v25, %v521_v28 }
 0x9a3   :  { %v526_v26 = vpop.permute.xlu0 %525 }
 0x9a4   :  { %v528_v27 = vmul.f32 %v1347_v25, %v526_v26 }
 0x9a6   :  { %530 = vrot.lane.b32.xlu1 %v528_v27, %s1414_s3 }
 0xa18   :  { %v531_v30 = vpop.permute.xlu1 %530 }
 0xa19   :  { %v533_v31 = vadd.f32 %v531_v30, %v523_v29 }
 0xa1b   :  { %1348 = vtanh.f32 %v533_v31  ;;  %v625_v46 = vrot.slane %v533_v31, 6 }
 0xa25   :  { %v1349_v17 = vpop.eup %1348 }
 0xa26   :  { %536 = vrot.lane.b32.xlu0 %v1349_v17, %s1413_s12 }
 0xa98   :  { %v537_v32 = vpop.permute.xlu0 %536 }
 0xa99   :  { %v539_v33 = vmul.f32 %v1347_v25, %v537_v32 }
 0xa9b   :  { %v541_v34 = vrot.slane %v539_v33, 6 }
 0xa9d   :  { %542 = vrot.lane.b32.xlu1 %v541_v34, %s1414_s3 }
 0xb0f   :  { %v543_v35 = vpop.permute.xlu1 %542 }
 0xb10   :  { %1208 = vmatmul.mubr.msk.f32.vlgmr.msra.gmra.mrb[4].mxu1 %vm121_vm2, %v543_v35 }
 0xb11   :  { %1296 = vmatpush3.bf16.msra.mxu1 %v1467_v7  ;;  %1229 = vmatprep.mubr.msk.f32.mxu1 %vm1411_vm1, %v1412_v10 }
 0xb12   :  { %1297 = vmatprep.subr.bf16.mxu1 %v1410_v3 }
 0xb15   :  { %1299 = vmatpush3.bf16.msra.mxu1 %v1482_v12 }
 0xb16   :  { %1306 = vmatprep.subr.bf16.mxu1 %v1410_v3 }
 0xbe3   :  { %v612_v36 = vpop.f32.mrb[4].mxu1 }
 0xbe4   :  { %v616_v37 = vadd.f32 %v612_v36, %v1505_v15  ;;  %v1209_v38 = vpop.f32.mrb[5].mxu1 }
 0xbe6   :  { %1350 = vtanh.f32 %v616_v37  ;;  %v1090_v40 = vmul.f32 -1.442695, %v616_v37 }
 0xbe8   :  { %1352 = vpow2.f32 %v1090_v40 }
 0xbf0   :  { %v1351_v39 = vpop.eup %1350 }
 0xbf1   :  { %629 = vrot.lane.b32.xlu0 %v1351_v39, %s1413_s12 }
 0xbf2   :  { %v1353_v41 = vpop.eup %1352 }
 0xbf3   :  { %v620_v42 = vadd.f32 1.0, %v1353_v41 }
 0xbf5   :  { %1354 = vrcp.f32 %v620_v42 }
 0xbff   :  { %v1355_v43 = vpop.eup %1354 }
 0xc00   :  { %v627_v47 = vmul.f32 %v1355_v43, %v625_v46 }
 0xc63   :  { %v630_v44 = vpop.permute.xlu0 %629 }
 0xc64   :  { %v632_v45 = vmul.f32 %v1355_v43, %v630_v44 }
 0xc66   :  { %634 = vrot.lane.b32.xlu1 %v632_v45, %s1414_s3 }
 0xcd8   :  { %v635_v48 = vpop.permute.xlu1 %634 }
 0xcd9   :  { %v637_v49 = vadd.f32 %v635_v48, %v627_v47  ;;  %v965_v47 = vld [vmem:[%s1623_s4 + $0x8] sm:$0xff]  ;;  %v966_v48 = vld [vmem:[%s1623_s4 + $0x10] sm:$0xff] }
 0xcdb   :  { %1356 = vtanh.f32 %v637_v49 }
 0xce5   :  { %v1357_v50 = vpop.eup %1356 }
 0xce6   :  { %640 = vrot.lane.b32.xlu0 %v1357_v50, %s1413_s12  ;;  %v967_v50 = vld [vmem:[%s1623_s4 + $0x18] sm:$0xff] }
 0xd58   :  { %v641_v51 = vpop.permute.xlu0 %640 }
 0xd59   :  { %v643_v52 = vmul.f32 %v1355_v43, %v641_v51  ;;  %v1310_v51 = vpack.c.bf16 %v967_v50, %v966_v48 }
 0xd5b   :  { %645 = vrot.lane.b32.xlu1 %v643_v52, %s1414_s3 }
 0xdcd   :  { %v646_v53 = vpop.permute.xlu1 %645 }
 0xdce   :  { %1219 = vmatmul.mubr.msk.f32.vlgmr.msra.gmra.mrb[6].mxu0 %vm121_vm2, %v646_v53 }
 0xdcf   :  { %1302 = vmatpush3.bf16.msra.mxu0 %v1467_v7  ;;  %1240 = vmatprep.mubr.msk.f32.mxu0 %vm1411_vm1, %v1412_v10 }
 0xdd0   :  { %1303 = vmatprep.subr.bf16.mxu0 %v1410_v3 }
 0xdd3   :  { %1305 = vmatpush3.bf16.msra.mxu0 %v1482_v12  ;;  %v731_v12 = vrot.slane %v637_v49, 6 }
 0xea1   :  { %v715_v54 = vpop.f32.mrb[6].mxu0 }
 0xea2   :  { %v720_v55 = vrot.slane %v715_v54, 6  ;;  %v1220_v56 = vpop.f32.mrb[7].mxu0 }
 0xea4   :  { %v722_v57 = vadd.f32 %v720_v55, %v1505_v15 }
 0xea6   :  { %1358 = vtanh.f32 %v722_v57  ;;  %v1092_v59 = vmul.f32 -1.442695, %v722_v57  ;;  %v1097_v57 = vld [vmem:[%s1624_s5] ss:$0 sm:$0xff] }
 0xea8   :  { %1360 = vpow2.f32 %v1092_v59 }
 0xeb0   :  { %v1359_v58 = vpop.eup %1358 }
 0xeb1   :  { %735 = vrot.lane.b32.xlu0 %v1359_v58, %s1413_s12 }
 0xeb2   :  { %v1361_v60 = vpop.eup %1360 }
 0xeb3   :  { %v726_v7 = vadd.f32 1.0, %v1361_v60 }
 0xeb5   :  { %1362 = vrcp.f32 %v726_v7 }
 0xebf   :  { %v1363_v61 = vpop.eup %1362 }
 0xec0   :  { %v733_v0 = vmul.f32 %v1363_v61, %v731_v12 }
 0xf23   :  { %v736_v62 = vpop.permute.xlu0 %735 }
 0xf24   :  { %v738_v63 = vmul.f32 %v1363_v61, %v736_v62 }
 0xf26   :  { %740 = vrot.lane.b32.xlu1 %v738_v63, %s1414_s3 }
 0xf98   :  { %v741_v1 = vpop.permute.xlu1 %740 }
 0xf99   :  { %v743_v2 = vadd.f32 %v741_v1, %v733_v0 }
 0xf9b   :  { %1364 = vtanh.f32 %v743_v2 }
 0xfa5   :  { %v1365_v4 = vpop.eup %1364 }
 0xfa6   :  { %746 = vrot.lane.b32.xlu0 %v1365_v4, %s1413_s12 }
0x1018   :  { %v747_v5 = vpop.permute.xlu0 %746 }
0x1019   :  { %v749_v6 = vmul.f32 %v1363_v61, %v747_v5 }
0x101b   :  { %v751_v8 = vrot.slane %v749_v6, 2 }
0x101d   :  { %752 = vrot.lane.b32.xlu1 %v751_v8, %s1414_s3 }
0x108f   :  { %v753_v9 = vpop.permute.xlu1 %752 }
0x1090   :  { %1230 = vmatmul.mubr.msk.f32.vlgmr.msra.gmra.mrb[6].mxu1 %vm121_vm2, %v753_v9 }
0x1091   :  { %1251 = vmatprep.mubr.msk.f32.mxu1 %vm1411_vm1, %v1412_v10  ;;  %v838_v10 = vrot.slane %v743_v2, 6 }
0x1163   :  { %v822_v11 = vpop.f32.mrb[6].mxu1 }
0x1164   :  { %v827_v13 = vrot.slane %v822_v11, 4  ;;  %v1231_v14 = vpop.f32.mrb[7].mxu1 }
0x1166   :  { %v829_v16 = vadd.f32 %v827_v13, %v1505_v15 }
0x1168   :  { %1366 = vtanh.f32 %v829_v16  ;;  %v1094_v19 = vmul.f32 -1.442695, %v829_v16 }
0x116a   :  { %1368 = vpow2.f32 %v1094_v19 }
0x1172   :  { %v1367_v18 = vpop.eup %1366 }
0x1173   :  { %842 = vrot.lane.b32.xlu0 %v1367_v18, %s1413_s12 }
0x1174   :  { %v1369_v20 = vpop.eup %1368 }
0x1175   :  { %v833_v21 = vadd.f32 1.0, %v1369_v20 }
0x1177   :  { %1370 = vrcp.f32 %v833_v21 }
0x1181   :  { %v1371_v22 = vpop.eup %1370 }
0x1182   :  { %v840_v25 = vmul.f32 %v1371_v22, %v838_v10 }
0x11e5   :  { %v843_v23 = vpop.permute.xlu0 %842 }
0x11e6   :  { %v845_v24 = vmul.f32 %v1371_v22, %v843_v23 }
0x11e8   :  { %847 = vrot.lane.b32.xlu1 %v845_v24, %s1414_s3 }
0x125a   :  { %v848_v26 = vpop.permute.xlu1 %847 }
0x125b   :  { %v850_v27 = vadd.f32 %v848_v26, %v840_v25 }
0x125d   :  { %1372 = vtanh.f32 %v850_v27  ;;  %v945_v43 = vrot.slane %v850_v27, 6 }
0x1267   :  { %v1373_v28 = vpop.eup %1372 }
0x1268   :  { %853 = vrot.lane.b32.xlu0 %v1373_v28, %s1413_s12 }
0x12da   :  { %v854_v29 = vpop.permute.xlu0 %853 }
0x12db   :  { %v856_v30 = vmul.f32 %v1371_v22, %v854_v29 }
0x12dd   :  { %v858_v31 = vrot.slane %v856_v30, 4 }
0x12df   :  { %859 = vrot.lane.b32.xlu1 %v858_v31, %s1414_s3 }
0x1351   :  { %v860_v17 = vpop.permute.xlu1 %859 }
0x1352   :  { %1241 = vmatmul.mubr.msk.f32.vlgmr.msra.gmra.mrb[8].mxu0 %vm121_vm2, %v860_v17 }
0x1425   :  { %v929_v32 = vpop.f32.mrb[8].mxu0 }
0x1426   :  { %v934_v33 = vrot.slane %v929_v32, 2  ;;  %v1242_v34 = vpop.f32.mrb[9].mxu0 }
0x1428   :  { %v936_v35 = vadd.f32 %v934_v33, %v1505_v15  ;;  %v964_v15 = vld [vmem:[%s1623_s4] sm:$0xff]  ;;  %s1415_s4 = smov [#allocation2]  }
0x1429   :  { %v1307_v49 = vpack.c.bf16 %v965_v47, %v964_v15  ;;  %s1071_s5 = sshll.u32 %s1415_s4, 4  ;;  %s1072_s5 = int_to_ptr.vmem [resolvable:$true] %s1071_s5 }
0x142a   :  { %1374 = vtanh.f32 %v936_v35  ;;  %v1096_v37 = vmul.f32 -1.442695, %v936_v35  ;;  %s1386_s23 = scalar_lea.vmem %s1072_s5, 32  ;;  %p1391_p1 = scmp.lt.s32.totalorder %s1072_s5, %s1072_s5 }
0x142b   :  { %1308 = vmatpush3.bf16.msra.mxu1 %v1307_v49  ;;  %p1387_p0 = scmp.ne.s32.totalorder %s1072_s5, %s1386_s23  ;;  %p1392_p2 = scmp.lt.s32.totalorder %s1386_s23, %s1386_s23 }
0x142c   :  { %1376 = vpow2.f32 %v1096_v37  ;;  %1309 = vmatprep.subr.bf16.mxu1 %v1410_v3 }
0x142d   :  { %p1393_p3 = por %p1392_p2, %p1391_p1 }
0x142f   :  { %1311 = vmatpush3.bf16.msra.mxu1 %v1310_v51  ;;  %p1394_p4 = pnand %p1393_p3, %p1387_p0 }
0x1434   :  { %v1375_v36 = vpop.eup %1374 }
0x1435   :  { %949 = vrot.lane.b32.xlu0 %v1375_v36, %s1413_s12 }
0x1436   :  { %v1377_v38 = vpop.eup %1376 }
0x1437   :  { %v940_v39 = vadd.f32 1.0, %v1377_v38 }
0x1439   :  { %1378 = vrcp.f32 %v940_v39 }
0x1443   :  { %v1379_v40 = vpop.eup %1378 }
0x1444   :  { %v947_v44 = vmul.f32 %v1379_v40, %v945_v43 }
0x14a7   :  { %v950_v41 = vpop.permute.xlu0 %949 }
0x14a8   :  { %v952_v42 = vmul.f32 %v1379_v40, %v950_v41 }
0x14aa   :  { %954 = vrot.lane.b32.xlu1 %v952_v42, %s1414_s3 }
0x151c   :  { %v955_v45 = vpop.permute.xlu1 %954 }
0x151d   :  { %v957_v46 = vadd.f32 %v955_v45, %v947_v44 }
0x151f   :  { %1380 = vtanh.f32 %v957_v46 }
0x1529   :  { %v1381_v52 = vpop.eup %1380 }
0x152a   :  { %960 = vrot.lane.b32.xlu0 %v1381_v52, %s1413_s12 }
0x159c   :  { %v961_v53 = vpop.permute.xlu0 %960 }
0x159d   :  { %v963_v54 = vmul.f32 %v1379_v40, %v961_v53 }
0x159f   :  { %v976_v55 = vrot.slane %v963_v54, 6 }
0x15a1   :  { %977 = vrot.lane.b32.xlu1 %v976_v55, %s1414_s3 }
0x1613   :  { %v978_v56 = vpop.permute.xlu1 %977 }
0x1614   :  { %1252 = vmatmul.mubr.msk.f32.vlgmr.msra.gmra.mrb[8].mxu1 %vm121_vm2, %v978_v56 }
0x16e7   :  { %v1047_v58 = vpop.f32.mrb[8].mxu1 }
0x16e8   :  { %v1048_v59 = vadd.f32 %v1097_v57, %v1047_v58  ;;  %v1253_v3 = vpop.f32.mrb[9].mxu1 }
0x16ea   :  { %v1052_v60 = vsel %vm1051_vm3, %v1048_v59, -inf }
0x16eb   :  { %1053 = vmax.xlane.f32.xlu0 %v1052_v60 }
0x1778   :  { %v1054_v7 = vpop.xlane.xlu0 %1053 }
0x1779   :  { %v1055_v61 = vsub.f32 %v1048_v59, %v1054_v7 }
0x177b   :  { %v1056_v62 = vmul.f32 1.442695, %v1055_v61 }
0x177d   :  { %1382 = vpow2.f32 %v1056_v62 }
0x1787   :  { %v1383_v63 = vpop.eup %1382 }
0x1788   :  { %v1058_v12 = vsel %vm1051_vm3, %v1383_v63, 0.0 }
0x1789   :  { %1059 = vadd.xlane.f32.xlu1 %v1058_v12 }
0x1816   :  { %v1060_v0 = vpop.xlane.xlu1 %1059 }
0x1817   :  { %1384 = vlog2.f32 %v1060_v0 }
0x1821   :  { %v1385_v1 = vpop.eup %1384 }
0x1822   :  { %v1062_v2 = vmul.f32 0.6931472, %v1385_v1 }
0x1824   :  { %v1063_v4 = vsub.f32 %v1055_v61, %v1062_v2 }
0x1826   :  { %1064 = vst.msk [vmem:[#allocation2] sm:$0x3] %vm1051_vm3, %v1063_v4 }
0x1827   :  { %1397 = shalt.err (!%p1394_p4)
}
0x1828   :  { %s1398_s26 = scalar_lea.hbm %s1625_s6, 32 }
0x1829   :  { %p1399_p5 = scmp.ne.s32.totalorder %s1625_s6, %s1398_s26  ;;  %p1402_p6 = scmp.lt.u32.totalorder %s1398_s26, %s1625_s6 }
0x182b   :  { %p1404_p7 = pnand %p1402_p6, %p1399_p5 }
0x182d   :  { %1407 = shalt.err (!%p1404_p7)
}
0x182e   :  { %1074 = dma.vmem_to_hbm [thread:$0]  %s1072_s5, 32, %s1625_s6, [#allocation3]  }
0x182f   :  { %1408 = dma.done.wait [#allocation3], 32  }
0x1830   :  { %1409 = vsyncadd [#allocation3], 4294967264 }
0x1831   :  { %1078 = vsyncpa [#allocation3], 1 }

</bundles_post_ra>
